<compile_context>
chip_gen: v7x
topology: tpu7x:2x2x1
jax: 0.10.0
libtpu: 0.0.40
codegen_flags: <defaults>
</compile_context>

<pallas_src>
import jax
import jax.numpy as jnp
from jax.experimental import pallas as pl
from jax.experimental.pallas import tpu as pltpu

LANE = 128   # TPU lane width
SUB = 16     # bf16 sublane tile (row alignment; also fine for f32)


def _round_up(n, m):
    return ((n + m - 1) // m) * m


def _pad2d(a, rows, cols):
    return jnp.pad(a, ((0, rows - a.shape[0]), (0, cols - a.shape[1])))


def _mlp_kernel(x_ref, w1_ref, b1_ref, w2_ref, b2_ref, w3_ref, b3_ref, o_ref):
    # In-kernel f32->bf16 cast of the raw (tm, input_dim) tile: keeps the HBM read at
    # 4*input_dim bytes/row instead of materializing a lane-padded bf16 copy of x.
    x = x_ref[...].astype(jnp.bfloat16)
    # Layer 1: bf16 matmul with f32 accumulation; bias + ReLU in f32.
    h = jnp.dot(x, w1_ref[...], preferred_element_type=jnp.float32)
    h = jnp.maximum(h + b1_ref[...], 0.0)
    # Layer 2.
    h = jnp.dot(h.astype(jnp.bfloat16), w2_ref[...], preferred_element_type=jnp.float32)
    h = jnp.maximum(h + b2_ref[...], 0.0)
    # Output head: lane-padded matmul, then store only the real out_dim columns.
    out = jnp.dot(h.astype(jnp.bfloat16), w3_ref[...], preferred_element_type=jnp.float32)
    out = out + b3_ref[...]
    o_ref[...] = out[:, : o_ref.shape[1]].astype(o_ref.dtype)
    # TODO(synk): if a profile ever shows exposed DMA at step boundaries, add
    # pipeline_mode=pl.Buffered(3) on the x BlockSpec (low priority per review).


def simple_nn_forward(x, params, *, tm=2048):
    """Fused MLP forward. x: (batch, input_dim) f32. Returns (batch, out_dim) f32."""
    w1, b1, w2, b2, w3, b3 = params
    batch, input_dim = x.shape
    hidden_dim = w1.shape[1]
    out_dim = w3.shape[1]

    hid_p = _round_up(hidden_dim, LANE)
    out_p = _round_up(out_dim, LANE)

    # Ragged batch: pad only to the 16-row sublane tile (at most 15 junk rows),
    # not to a multiple of tm.
    batch_p = _round_up(batch, SUB)
    x_in = x if batch_p == batch else jnp.pad(x, ((0, batch_p - batch), (0, 0)))

    # Batch tile: big (amortize per-step overhead), 16-aligned, never larger than the
    # padded batch, and small enough that the grid has >=2 steps when batch allows
    # (both v7x TensorCores get work).
    tm = min(tm, batch_p)
    if batch_p >= 2 * SUB:
        tm = min(tm, _round_up(pl.cdiv(batch_p, 2), SUB))
    tm = _round_up(tm, SUB)
    grid = (pl.cdiv(batch_p, tm),)   # partial last block OK: OOB output rows are dropped

    # Weights: bf16, lane-padded, VMEM-resident. Biases: f32.
    w1_p = _pad2d(w1, input_dim, hid_p).astype(jnp.bfloat16)
    w2_p = _pad2d(w2, hid_p, hid_p).astype(jnp.bfloat16)
    w3_p = _pad2d(w3, hid_p, out_p).astype(jnp.bfloat16)
    b1_p = _pad2d(b1, 1, hid_p).astype(jnp.float32)
    b2_p = _pad2d(b2, 1, hid_p).astype(jnp.float32)
    b3_p = _pad2d(b3, 1, out_p).astype(jnp.float32)

    resident = lambda shape: pl.BlockSpec(shape, lambda i: (0, 0))  # stays in VMEM

    flops = 2 * batch_p * (input_dim * hid_p + hid_p * hid_p + hid_p * out_p)
    bytes_accessed = (
        4 * batch_p * input_dim                                   # f32 x reads
        + 2 * (w1_p.size + w2_p.size + w3_p.size)                 # bf16 weight reads
        + 4 * (b1_p.size + b2_p.size + b3_p.size)                 # f32 bias reads
        + 4 * batch_p * out_dim                                   # f32 output writes
    )

    out = pl.pallas_call(
        _mlp_kernel,
        out_shape=jax.ShapeDtypeStruct((batch_p, out_dim), jnp.float32),
        grid=grid,
        in_specs=[
            pl.BlockSpec((tm, input_dim), lambda i: (i, 0)),      # x: streamed, unpadded cols
            resident((input_dim, hid_p)),                         # w1
            resident((1, hid_p)),                                 # b1
            resident((hid_p, hid_p)),                             # w2
            resident((1, hid_p)),                                 # b2
            resident((hid_p, out_p)),                             # w3
            resident((1, out_p)),                                 # b3
        ],
        out_specs=pl.BlockSpec((tm, out_dim), lambda i: (i, 0)),  # narrow f32 writeback
        compiler_params=pltpu.CompilerParams(
            dimension_semantics=("parallel",),                    # shard batch tiles across v7x's 2 TCs
        ),
        cost_estimate=pl.CostEstimate(
            flops=flops, transcendentals=0, bytes_accessed=bytes_accessed),
    )(x_in, w1_p, b1_p, w2_p, b2_p, w3_p, b3_p)

    return out[:batch] if batch_p != batch else out


def init_params(key, input_dim, hidden_dim=32, out_dim=2):
    """Deterministic synthetic parameter init (PyTorch Linear-like uniform).

    Weights are stored as [in_features, out_features] so the kernel does x @ W + b.
    """
    ks = jax.random.split(key, 6)

    def lin(kw, kb, fan_in, fan_out):
        bound = 1.0 / jnp.sqrt(fan_in)
        w = jax.random.uniform(kw, (fan_in, fan_out), jnp.float32, -bound, bound)
        b = jax.random.uniform(kb, (1, fan_out), jnp.float32, -bound, bound)
        return w, b

    w1, b1 = lin(ks[0], ks[1], input_dim, hidden_dim)
    w2, b2 = lin(ks[2], ks[3], hidden_dim, hidden_dim)
    w3, b3 = lin(ks[4], ks[5], hidden_dim, out_dim)
    return (w1, b1, w2, b2, w3, b3)


def _reference_forward(x, params):
    # Mirrors the kernel numerics: bf16 matmul operands, f32 accumulation / elementwise.
    w1, b1, w2, b2, w3, b3 = params
    bf = lambda a: a.astype(jnp.bfloat16).astype(jnp.float32)
    h = jnp.maximum(jnp.dot(bf(x), bf(w1)) + b1, 0.0)
    h = jnp.maximum(jnp.dot(bf(h), bf(w2)) + b2, 0.0)
    return jnp.dot(bf(h), bf(w3)) + b3


if __name__ == "__main__":
    key = jax.random.PRNGKey(0)
    k_x, k_p, k_x2 = jax.random.split(key, 3)

    input_dim, hidden_dim = 16, 32
    params = init_params(k_p, input_dim, hidden_dim=hidden_dim, out_dim=2)

    # Small batch: exercises 16-row padding + row slice-back, single grid step.
    batch = 8
    x = jax.random.normal(k_x, (batch, input_dim), jnp.float32)
    out = jax.block_until_ready(simple_nn_forward(x, params))
    ref = _reference_forward(x, params)
    assert out.shape == (batch, 2)
    assert jnp.allclose(out, ref, atol=2e-2, rtol=2e-2)

    # Larger batch: exercises the streamed multi-step grid (2 x 512-row tiles).
    batch2 = 1024
    x2 = jax.random.normal(k_x2, (batch2, input_dim), jnp.float32)
    out2 = jax.block_until_ready(simple_nn_forward(x2, params))
    ref2 = _reference_forward(x2, params)
    assert out2.shape == (batch2, 2)
    assert jnp.allclose(out2, ref2, atol=2e-2, rtol=2e-2)

    print("KERNEL_OK")
</pallas_src>

<mosaic_0001>
module attributes {stable_mosaic.version = 11 : i64} {
  func.func @_mlp_kernel(%arg0: i32, %arg1: memref<16x16xf32, #tpu.memory_space<vmem>>, %arg2: memref<16x128xbf16, #tpu.memory_space<vmem>>, %arg3: memref<1x128xf32, #tpu.memory_space<vmem>>, %arg4: memref<128x128xbf16, #tpu.memory_space<vmem>>, %arg5: memref<1x128xf32, #tpu.memory_space<vmem>>, %arg6: memref<128x128xbf16, #tpu.memory_space<vmem>>, %arg7: memref<1x128xf32, #tpu.memory_space<vmem>>, %arg8: memref<16x2xf32, #tpu.memory_space<vmem>>) attributes {dimension_semantics = [#tpu.dimension_semantics<parallel>], iteration_bounds = array<i64: 1>, scalar_prefetch = 0 : i64, scratch_operands = 0 : i64, tpu.core_type = #tpu.core_type<tc>, window_params = [{transform_indices = @transform_0, window_bounds = array<i64: 16, 16>}, {pipeline_mode = #tpu.pipeline_mode<synchronous>, transform_indices = @transform_1, window_bounds = array<i64: 16, 128>}, {pipeline_mode = #tpu.pipeline_mode<synchronous>, transform_indices = @transform_2, window_bounds = array<i64: 1, 128>}, {pipeline_mode = #tpu.pipeline_mode<synchronous>, transform_indices = @transform_3, window_bounds = array<i64: 128, 128>}, {pipeline_mode = #tpu.pipeline_mode<synchronous>, transform_indices = @transform_4, window_bounds = array<i64: 1, 128>}, {pipeline_mode = #tpu.pipeline_mode<synchronous>, transform_indices = @transform_5, window_bounds = array<i64: 128, 128>}, {pipeline_mode = #tpu.pipeline_mode<synchronous>, transform_indices = @transform_6, window_bounds = array<i64: 1, 128>}, {transform_indices = @transform_7, window_bounds = array<i64: 16, 2>}]} {
    %c0 = arith.constant 0 : index
    %c0_0 = arith.constant 0 : index
    %0 = vector.load %arg1[%c0, %c0_0] : memref<16x16xf32, #tpu.memory_space<vmem>>, vector<16x16xf32>
    %1 = arith.truncf %0 : vector<16x16xf32> to vector<16x16xbf16>
    %c0_1 = arith.constant 0 : index
    %c0_2 = arith.constant 0 : index
    %2 = vector.load %arg2[%c0_1, %c0_2] : memref<16x128xbf16, #tpu.memory_space<vmem>>, vector<16x128xbf16>
    %cst = arith.constant dense<0.000000e+00> : vector<16x128xf32>
    %3 = tpu.matmul %1, %2, %cst {dimension_numbers = #tpu.dot_dimension_numbers<[1], [0], [0], [1], [0, 0, 1, 1], [], []>} : vector<16x16xbf16>, vector<16x128xbf16>, vector<16x128xf32> -> vector<16x128xf32>
    %c0_3 = arith.constant 0 : index
    %c0_4 = arith.constant 0 : index
    %4 = vector.load %arg3[%c0_3, %c0_4] : memref<1x128xf32, #tpu.memory_space<vmem>>, vector<1x128xf32>
    %5 = vector.broadcast %4 : vector<1x128xf32> to vector<16x128xf32>
    %6 = arith.addf %3, %5 : vector<16x128xf32>
    %cst_5 = arith.constant 0.000000e+00 : f32
    %7 = vector.broadcast %cst_5 : f32 to vector<16x128xf32>
    %8 = arith.maximumf %6, %7 : vector<16x128xf32>
    %9 = arith.truncf %8 : vector<16x128xf32> to vector<16x128xbf16>
    %c0_6 = arith.constant 0 : index
    %c0_7 = arith.constant 0 : index
    %10 = vector.load %arg4[%c0_6, %c0_7] : memref<128x128xbf16, #tpu.memory_space<vmem>>, vector<128x128xbf16>
    %cst_8 = arith.constant dense<0.000000e+00> : vector<16x128xf32>
    %11 = tpu.matmul %9, %10, %cst_8 {dimension_numbers = #tpu.dot_dimension_numbers<[1], [0], [0], [1], [0, 0, 1, 1], [], []>} : vector<16x128xbf16>, vector<128x128xbf16>, vector<16x128xf32> -> vector<16x128xf32>
    %c0_9 = arith.constant 0 : index
    %c0_10 = arith.constant 0 : index
    %12 = vector.load %arg5[%c0_9, %c0_10] : memref<1x128xf32, #tpu.memory_space<vmem>>, vector<1x128xf32>
    %13 = vector.broadcast %12 : vector<1x128xf32> to vector<16x128xf32>
    %14 = arith.addf %11, %13 : vector<16x128xf32>
    %cst_11 = arith.constant 0.000000e+00 : f32
    %15 = vector.broadcast %cst_11 : f32 to vector<16x128xf32>
    %16 = arith.maximumf %14, %15 : vector<16x128xf32>
    %17 = arith.truncf %16 : vector<16x128xf32> to vector<16x128xbf16>
    %c0_12 = arith.constant 0 : index
    %c0_13 = arith.constant 0 : index
    %18 = vector.load %arg6[%c0_12, %c0_13] : memref<128x128xbf16, #tpu.memory_space<vmem>>, vector<128x128xbf16>
    %cst_14 = arith.constant dense<0.000000e+00> : vector<16x128xf32>
    %19 = tpu.matmul %17, %18, %cst_14 {dimension_numbers = #tpu.dot_dimension_numbers<[1], [0], [0], [1], [0, 0, 1, 1], [], []>} : vector<16x128xbf16>, vector<128x128xbf16>, vector<16x128xf32> -> vector<16x128xf32>
    %c0_15 = arith.constant 0 : index
    %c0_16 = arith.constant 0 : index
    %20 = vector.load %arg7[%c0_15, %c0_16] : memref<1x128xf32, #tpu.memory_space<vmem>>, vector<1x128xf32>
    %21 = vector.broadcast %20 : vector<1x128xf32> to vector<16x128xf32>
    %22 = arith.addf %19, %21 : vector<16x128xf32>
    %23 = vector.extract_strided_slice %22 {offsets = [0, 0], sizes = [16, 2], strides = [1, 1]} : vector<16x128xf32> to vector<16x2xf32>
    %c0_17 = arith.constant 0 : index
    %c0_18 = arith.constant 0 : index
    %24 = vector.load %arg8[%c0_17, %c0_18] : memref<16x2xf32, #tpu.memory_space<vmem>>, vector<16x2xf32>
    tpu.vector_store %arg8[%c0_17, %c0_18], %23 {strides = array<i32>} : memref<16x2xf32, #tpu.memory_space<vmem>>, vector<16x2xf32>,
    return
  }
  func.func @transform_0(%arg0: i32) -> (i32, i32) {
    %c0_i32 = arith.constant 0 : i32
    %c0_i32_0 = arith.constant 0 : i32
    return %arg0, %c0_i32 : i32, i32
  }
  func.func @transform_1(%arg0: i32) -> (i32, i32) {
    %c0_i32 = arith.constant 0 : i32
    %c0_i32_0 = arith.constant 0 : i32
    %c0_i32_1 = arith.constant 0 : i32
    return %c0_i32, %c0_i32_0 : i32, i32
  }
  func.func @transform_2(%arg0: i32) -> (i32, i32) {
    %c0_i32 = arith.constant 0 : i32
    %c0_i32_0 = arith.constant 0 : i32
    %c0_i32_1 = arith.constant 0 : i32
    return %c0_i32, %c0_i32_0 : i32, i32
  }
  func.func @transform_3(%arg0: i32) -> (i32, i32) {
    %c0_i32 = arith.constant 0 : i32
    %c0_i32_0 = arith.constant 0 : i32
    %c0_i32_1 = arith.constant 0 : i32
    return %c0_i32, %c0_i32_0 : i32, i32
  }
  func.func @transform_4(%arg0: i32) -> (i32, i32) {
    %c0_i32 = arith.constant 0 : i32
    %c0_i32_0 = arith.constant 0 : i32
    %c0_i32_1 = arith.constant 0 : i32
    return %c0_i32, %c0_i32_0 : i32, i32
  }
  func.func @transform_5(%arg0: i32) -> (i32, i32) {
    %c0_i32 = arith.constant 0 : i32
    %c0_i32_0 = arith.constant 0 : i32
    %c0_i32_1 = arith.constant 0 : i32
    return %c0_i32, %c0_i32_0 : i32, i32
  }
  func.func @transform_6(%arg0: i32) -> (i32, i32) {
    %c0_i32 = arith.constant 0 : i32
    %c0_i32_0 = arith.constant 0 : i32
    %c0_i32_1 = arith.constant 0 : i32
    return %c0_i32, %c0_i32_0 : i32, i32
  }
  func.func @transform_7(%arg0: i32) -> (i32, i32) {
    %c0_i32 = arith.constant 0 : i32
    %c0_i32_0 = arith.constant 0 : i32
    return %arg0, %c0_i32 : i32, i32
  }
}

</mosaic_0001>

<bundles_post_ra>
// kernel: tpu_custom_call.1
= control target key start
LH: loop header
LB: loop body
LE: loop exit
PB: predicated region body
PF: predicated region fallthrough
CT: control target
= control target key end

     0   :  { %12 = vsyncpa [#allocation3], 0  ;;  %s745_s0 = inlined_call_operand.hbm [shape: f32[16,16], index: 0, kind: input, shape index: {}]   ;;  %s746_s1 = inlined_call_operand.hbm [shape: bf16[16,128], index: 1, kind: input, shape index: {}]   ;;  %s747_s2 = inlined_call_operand.vmem [shape: f32[1,128], index: 2, kind: input, shape index: {}]   ;;  %s748_s3 = inlined_call_operand.hbm [shape: bf16[128,128], index: 3, kind: input, shape index: {}]   ;;  %s749_s4 = inlined_call_operand.vmem [shape: f32[1,128], index: 4, kind: input, shape index: {}]   ;;  %s750_s5 = inlined_call_operand.hbm [shape: bf16[128,128], index: 5, kind: input, shape index: {}]   ;;  %s751_s6 = inlined_call_operand.vmem [shape: f32[1,128], index: 6, kind: input, shape index: {}]   ;;  %s752_s7 = inlined_call_operand.vmem [shape: f32[16,2], index: 7, kind: output, shape index: {}]  }
   0x1   :  { %13 = vsyncpa [#allocation5], 0 }
   0x2   :  { %14 = vsyncpa [#allocation8], 0  ;;  %s593_s24 = smov [#allocation4]   ;;  %s499_s28 = scalar_lea.hbm %s746_s1, 128 }
   0x3   :  { %s32_s25 = sshll.u32 %s593_s24, 4  ;;  %p500_p0 = scmp.ne.s32.totalorder %s746_s1, %s499_s28  ;;  %s33_s25 = int_to_ptr.vmem [resolvable:$true] %s32_s25 }
   0x4   :  { %p503_p1 = scmp.lt.u32.totalorder %s499_s28, %s746_s1 }
   0x6   :  { %p505_p2 = pnand %p503_p1, %p500_p0 }
   0x8   :  { %508 = shalt.err (!%p505_p2)
}
   0x9   :  { %s509_s10 = scalar_lea.vmem %s33_s25, 128  ;;  %p514_p4 = scmp.lt.s32.totalorder %s33_s25, %s33_s25 }
   0xa   :  { %p510_p3 = scmp.ne.s32.totalorder %s33_s25, %s509_s10  ;;  %p515_p5 = scmp.lt.s32.totalorder %s509_s10, %s509_s10 }
   0xc   :  { %p516_p6 = por %p515_p5, %p514_p4 }
   0xe   :  { %p517_p7 = pnand %p516_p6, %p510_p3 }
  0x10   :  { %520 = shalt.err (!%p517_p7)
}
  0x11   :  { %s594_s11 = smov 64   ;;  %s595_s12 = smov 4  }
  0x12   :  { %38 = dma.hbm_to_vmem [thread:$0]  %s746_s1, 128, %s33_s25, [#allocation5], %s594_s11, %s594_s11, %s595_s12  }
  0x13   :  { %s596_s15 = smov [#allocation2]   ;;  %s521_s19 = scalar_lea.hbm %s745_s0, 256 }
  0x14   :  { %s20_s16 = sshll.u32 %s596_s15, 4  ;;  %p522_p8 = scmp.ne.s32.totalorder %s745_s0, %s521_s19  ;;  %s21_s16 = int_to_ptr.vmem [resolvable:$true] %s20_s16 }
  0x15   :  { %p525_p9 = scmp.lt.u32.totalorder %s521_s19, %s745_s0 }
  0x17   :  { %p527_p10 = pnand %p525_p9, %p522_p8 }
  0x19   :  { %530 = shalt.err (!%p527_p10)
}
  0x1a   :  { %s531_s24 = scalar_lea.vmem %s21_s16, 256  ;;  %p536_p12 = scmp.lt.s32.totalorder %s21_s16, %s21_s16 }
  0x1b   :  { %p532_p11 = scmp.ne.s32.totalorder %s21_s16, %s531_s24  ;;  %p537_p13 = scmp.lt.s32.totalorder %s531_s24, %s531_s24 }
  0x1d   :  { %p538_p0 = por %p537_p13, %p536_p12 }
  0x1f   :  { %p539_p1 = pnand %p538_p0, %p532_p11 }
  0x21   :  { %542 = shalt.err (!%p539_p1)
}
  0x22   :  { %s597_s1 = smov 128   ;;  %s598_s25 = smov 8  }
  0x23   :  { %26 = dma.hbm_to_vmem [thread:$0]  %s745_s0, 256, %s21_s16, [#allocation3], %s597_s1, %s597_s1, %s598_s25  }
  0x24   :  { %s599_s28 = smov [#allocation6]   ;;  %s600_s30 = smov [#allocation7]  }
  0x25   :  { %s46_s29 = sshll.u32 %s599_s28, 4  ;;  %s60_s8 = sshll.u32 %s600_s30, 4  ;;  %s47_s29 = int_to_ptr.vmem [resolvable:$true] %s46_s29  ;;  %s670_s8 = int_to_ptr.vmem [resolvable:$true] %s60_s8 }
  0x26   :  { %s543_s13 = scalar_lea.hbm %s748_s3, 1024 }
  0x27   :  { %p544_p2 = scmp.ne.s32.totalorder %s748_s3, %s543_s13  ;;  %p547_p3 = scmp.lt.u32.totalorder %s543_s13, %s748_s3 }
  0x29   :  { %p549_p4 = pnand %p547_p3, %p544_p2 }
  0x2b   :  { %552 = shalt.err (!%p549_p4)
}
  0x2c   :  { %s553_s0 = scalar_lea.vmem %s47_s29, 1024  ;;  %p558_p6 = scmp.lt.s32.totalorder %s47_s29, %s47_s29 }
  0x2d   :  { %p554_p5 = scmp.ne.s32.totalorder %s47_s29, %s553_s0  ;;  %p559_p7 = scmp.lt.s32.totalorder %s553_s0, %s553_s0 }
  0x2f   :  { %p560_p8 = por %p559_p7, %p558_p6 }
  0x31   :  { %p561_p9 = pnand %p560_p8, %p554_p5 }
  0x33   :  { %564 = shalt.err (!%p561_p9)
}
  0x34   :  { %52 = dma.hbm_to_vmem [thread:$0]  %s748_s3, 1024, %s47_s29, [#allocation5], %s594_s11, %s594_s11, %s595_s12  }
  0x35   :  { %s565_s22 = scalar_lea.hbm %s750_s5, 1024 }
  0x36   :  { %p566_p10 = scmp.ne.s32.totalorder %s750_s5, %s565_s22  ;;  %p569_p11 = scmp.lt.u32.totalorder %s565_s22, %s750_s5 }
  0x38   :  { %p571_p12 = pnand %p569_p11, %p566_p10 }
  0x3a   :  { %574 = shalt.err (!%p571_p12)
}
  0x3b   :  { %s575_s26 = scalar_lea.vmem %s670_s8, 1024  ;;  %p580_p0 = scmp.lt.s32.totalorder %s670_s8, %s670_s8 }
  0x3c   :  { %p576_p13 = scmp.ne.s32.totalorder %s670_s8, %s575_s26  ;;  %p581_p1 = scmp.lt.s32.totalorder %s575_s26, %s575_s26 }
  0x3e   :  { %p582_p2 = por %p581_p1, %p580_p0 }
  0x40   :  { %p583_p3 = pnand %p582_p2, %p576_p13 }
  0x42   :  { %586 = shalt.err (!%p583_p3)
}
  0x43   :  { %66 = dma.hbm_to_vmem [thread:$0]  %s750_s5, 1024, %s670_s8, [#allocation8], %s594_s11, %s594_s11, %s595_s12  }
  0x44   :  { %587 = dma.done.wait [#allocation3], 256  }
  0x45   :  { %588 = vsyncadd [#allocation3], 4294967040 }
  0x46   :  { %589 = dma.done.wait [#allocation5], 1152  }
  0x47   :  { %590 = vsyncadd [#allocation5], 4294966144 }
  0x48   :  { %591 = dma.done.wait [#allocation8], 1024  }
  0x49   :  { %592 = vsyncadd [#allocation8], 4294966272  ;;  %v601_v0 = vmov 0.0   ;;  %vm602_vm0 = vmmov 0   ;;  %v482_v1 = vld [vmem:[#allocation4] sm:$0xff]   ;;  %v82_v2 = vld [vmem:[#allocation2] sm:$0xff] }
  0x4a   :  { %426 = vmatprep.subr.bf16.mxu0 %v601_v0  ;;  %428 = vmatprep.mubr.msk.bf16.mxu0 %vm602_vm0, %v601_v0  ;;  %v83_v3 = vld [vmem:[#allocation2 + $0x8] sm:$0xff]  ;;  %vm100_vm1 = vcmask 130048   ;;  %v483_v5 = vld [vmem:[#allocation6] sm:$0xff]   ;;  %v484_v6 = vld [vmem:[#allocation6 + $0x8] sm:$0xff]   ;;  %vm375_vm2 = vcmask 15360  }
  0x4b   :  { %432 = vmatprep.subr.bf16.mxu1 %v601_v0  ;;  %448 = vmatprep.mubr.msk.bf16.mxu1 %vm602_vm0, %v601_v0  ;;  %v84_v4 = vpack.c.bf16 %v83_v3, %v82_v2  ;;  %v485_v7 = vld [vmem:[#allocation6 + $0x10] sm:$0xff]   ;;  %v486_v8 = vld [vmem:[#allocation6 + $0x18] sm:$0xff]   ;;  %v487_v9 = vld [vmem:[#allocation6 + $0x20] sm:$0xff]  }
  0x4c   :  { %427 = vmatpush3.bf16.msra.mxu0 %v482_v1  ;;  %433 = vmatpush3.bf16.msra.mxu1 %v483_v5  ;;  %v488_v10 = vld [vmem:[#allocation6 + $0x28] sm:$0xff]   ;;  %v489_v11 = vld [vmem:[#allocation6 + $0x30] sm:$0xff]   ;;  %v490_v12 = vld [vmem:[#allocation6 + $0x38] sm:$0xff]  }
  0x4d   :  { %452 = vmatprep.subr.bf16.mxu0 %v601_v0  ;;  %434 = vmatprep.subr.bf16.mxu1 %v601_v0  ;;  %v491_v13 = vld [vmem:[#allocation7] sm:$0xff]   ;;  %v492_v14 = vld [vmem:[#allocation7 + $0x8] sm:$0xff]   ;;  %v493_v15 = vld [vmem:[#allocation7 + $0x10] sm:$0xff]  }
  0x4e   :  { %v494_v16 = vld [vmem:[#allocation7 + $0x18] sm:$0xff]   ;;  %v495_v17 = vld [vmem:[#allocation7 + $0x20] sm:$0xff]   ;;  %v496_v18 = vld [vmem:[#allocation7 + $0x28] sm:$0xff]  }
  0x4f   :  { %429 = vmatmul.mubr.msk.bf16.vlgmr.msra.gmra.mrb[0].mxu0 %vm100_vm1, %v84_v4  ;;  %v385_v19 = vld [vmem:[%s747_s2] ss:$0 sm:$0xff]  ;;  %v497_v29 = vld [vmem:[#allocation7 + $0x30] sm:$0xff]   ;;  %v498_v30 = vld [vmem:[#allocation7 + $0x38] sm:$0xff]  }
  0x50   :  { %468 = vmatprep.mubr.msk.bf16.mxu0 %vm602_vm0, %v601_v0  ;;  %435 = vmatpush3.bf16.msra.mxu1 %v484_v6  ;;  %v388_v31 = vld [vmem:[%s749_s4] ss:$0 sm:$0xff] }
  0x51   :  { %436 = vmatprep.subr.bf16.mxu1 %v601_v0  ;;  %453 = vmatpush3.bf16.msra.mxu0 %v491_v13  ;;  %v397_v41 = vld [vmem:[%s751_s6] ss:$0 sm:$0xff] }
  0x52   :  { %454 = vmatprep.subr.bf16.mxu0 %v601_v0 }
  0x54   :  { %437 = vmatpush3.bf16.msra.mxu1 %v485_v7 }
  0x55   :  { %438 = vmatprep.subr.bf16.mxu1 %v601_v0  ;;  %455 = vmatpush3.bf16.msra.mxu0 %v492_v14 }
  0x56   :  { %456 = vmatprep.subr.bf16.mxu0 %v601_v0 }
  0x58   :  { %439 = vmatpush3.bf16.msra.mxu1 %v486_v8 }
  0x59   :  { %440 = vmatprep.subr.bf16.mxu1 %v601_v0  ;;  %457 = vmatpush3.bf16.msra.mxu0 %v493_v15 }
  0x5a   :  { %458 = vmatprep.subr.bf16.mxu0 %v601_v0 }
  0x5c   :  { %441 = vmatpush3.bf16.msra.mxu1 %v487_v9 }
  0x5d   :  { %442 = vmatprep.subr.bf16.mxu1 %v601_v0  ;;  %459 = vmatpush3.bf16.msra.mxu0 %v494_v16 }
  0x5e   :  { %460 = vmatprep.subr.bf16.mxu0 %v601_v0 }
  0x60   :  { %443 = vmatpush3.bf16.msra.mxu1 %v488_v10 }
  0x61   :  { %444 = vmatprep.subr.bf16.mxu1 %v601_v0  ;;  %461 = vmatpush3.bf16.msra.mxu0 %v495_v17 }
  0x62   :  { %462 = vmatprep.subr.bf16.mxu0 %v601_v0 }
  0x64   :  { %445 = vmatpush3.bf16.msra.mxu1 %v489_v11 }
  0x65   :  { %446 = vmatprep.subr.bf16.mxu1 %v601_v0  ;;  %463 = vmatpush3.bf16.msra.mxu0 %v496_v18 }
  0x66   :  { %464 = vmatprep.subr.bf16.mxu0 %v601_v0 }
  0x68   :  { %447 = vmatpush3.bf16.msra.mxu1 %v490_v12 }
  0x69   :  { %465 = vmatpush3.bf16.msra.mxu0 %v497_v29 }
  0x6a   :  { %466 = vmatprep.subr.bf16.mxu0 %v601_v0 }
  0x6d   :  { %467 = vmatpush3.bf16.msra.mxu0 %v498_v30 }
 0x122   :  { %v138_v20 = vpop.f32.mrb[0].mxu0 }
 0x123   :  { %v139_v21 = vadd.f32 %v385_v19, %v138_v20  ;;  %v430_v22 = vpop.f32.mrb[1].mxu0 }
 0x124   :  { %v141_v23 = vpop.f32.mrb[2].mxu0 }
 0x125   :  { %v142_v24 = vadd.f32 %v385_v19, %v141_v23  ;;  %v431_v25 = vpop.f32.mrb[3].mxu0  ;;  %v145_v26 = vmax.f32 %v139_v21, 0.0 }
 0x127   :  { %v146_v27 = vmax.f32 %v142_v24, 0.0 }
 0x129   :  { %v147_v28 = vpack.c.bf16 %v146_v27, %v145_v26 }
 0x12b   :  { %449 = vmatmul.mubr.bf16.vlgmr.msra.gmra.mrb[0].mxu1 %v147_v28 }
 0x1fe   :  { %v253_v32 = vpop.f32.mrb[0].mxu1 }
 0x1ff   :  { %v254_v33 = vadd.f32 %v388_v31, %v253_v32  ;;  %v450_v34 = vpop.f32.mrb[1].mxu1 }
 0x200   :  { %v256_v35 = vpop.f32.mrb[2].mxu1 }
 0x201   :  { %v257_v36 = vadd.f32 %v388_v31, %v256_v35  ;;  %v451_v37 = vpop.f32.mrb[3].mxu1  ;;  %v260_v38 = vmax.f32 %v254_v33, 0.0 }
 0x203   :  { %v261_v39 = vmax.f32 %v257_v36, 0.0 }
 0x205   :  { %v262_v40 = vpack.c.bf16 %v261_v39, %v260_v38 }
 0x207   :  { %469 = vmatmul.mubr.bf16.vlgmr.msra.gmra.mrb[4].mxu0 %v262_v40 }
 0x2da   :  { %v368_v42 = vpop.f32.mrb[4].mxu0 }
 0x2db   :  { %v369_v43 = vadd.f32 %v397_v41, %v368_v42  ;;  %v470_v44 = vpop.f32.mrb[5].mxu0 }
 0x2dc   :  { %v371_v45 = vpop.f32.mrb[6].mxu0 }
 0x2dd   :  { %376 = vst.msk [vmem:[%s752_s7] sm:$0xff] %vm375_vm2, %v369_v43  ;;  %v372_v46 = vadd.f32 %v397_v41, %v371_v45  ;;  %v471_v47 = vpop.f32.mrb[7].mxu0 }
 0x2df   :  { %377 = vst.msk [vmem:[%s752_s7 + $0x8] sm:$0xff] %vm375_vm2, %v372_v46 }
 0x2e0   :  { %382 = vsyncpa [#allocation3], 1 }
 0x2e1   :  { %383 = vsyncpa [#allocation5], 1 }
 0x2e2   :  { %384 = vsyncpa [#allocation8], 1 }

</bundles_post_ra>
